<compile_context>
chip_gen: v6e
topology: v6e:2x2x1
jax: 0.10.0
libtpu: 0.0.40
codegen_flags: <defaults>
</compile_context>

<pallas_src>
import functools

import jax
import jax.numpy as jnp
from jax.experimental import pallas as pl
from jax.experimental.pallas import tpu as pltpu

_LANE = 128     # lane width (last-dim alignment target)
_SUBLANE = 8    # sublane width (second-to-last-dim alignment target)


def _round_up(x, m):
    return ((x + m - 1) // m) * m


def _linear_kernel(z_ref, w_ref, b_ref, o_ref):
    # One (TB, F) x (F, TN) MXU matmul with f32 accumulation, then an f32 bias
    # add broadcast over the batch tile. The class tile TN is a multiple of
    # 128, so the output store is a full-lane unmasked vst (except the grid
    # edge block on a ragged batch, which Pallas masks).
    acc = jnp.dot(z_ref[...], w_ref[...], preferred_element_type=jnp.float32)
    o_ref[...] = (acc + b_ref[...].astype(jnp.float32)).astype(o_ref.dtype)


def prepare_classifier_params(w, b, compute_dtype=jnp.float32):
    """One-time parameter prep (hoisted out of the per-call path).

    w: [C, F] (PyTorch nn.Linear layout) -> [F, Cp] transposed + class-padded
    b: [C]                               -> [1, Cp] f32, class-padded
    where Cp = round_up(C, 128). Do this once at model init; the per-call
    wrapper then pays zero weight-side HBM traffic.
    """
    C, F = w.shape
    Cp = _round_up(C, _LANE)
    w_fc = jnp.pad(jnp.transpose(w), ((0, 0), (0, Cp - C))).astype(compute_dtype)
    b_p = jnp.pad(b.reshape(1, C).astype(jnp.float32), ((0, 0), (0, Cp - C)))
    return w_fc, b_p


@functools.partial(jax.jit, static_argnames=("classes", "block_b", "block_c"))
def classifier_apply(z, w_fc, b_p, *, classes, block_b=256, block_c=512):
    """Hot-path forward with prepared params.

    z:    [B, F]   activations (f32 or bf16)
    w_fc: [F, Cp]  prepared weight (Cp multiple of 128)
    b_p:  [1, Cp]  prepared bias (f32)
    returns: [B, classes] float32
    """
    B, F = z.shape
    Fw, Cp = w_fc.shape
    assert Fw == F and b_p.shape == (1, Cp) and Cp % _LANE == 0
    assert classes <= Cp

    # ---- tile selection (all trace-time Python) --------------------------
    # Batch tile: multiple of 8, no larger than needed.
    TB = _round_up(min(max(block_b, _SUBLANE), _round_up(B, _SUBLANE)), _SUBLANE)
    # Class tile: largest of {block_c, 256, 128} (rounded to 128) dividing Cp.
    TN = Cp
    for cand in (block_c, 256, _LANE):
        cand = max(_LANE, _round_up(cand, _LANE))
        if Cp % cand == 0:
            TN = min(cand, Cp)
            break

    in_bytes = jnp.dtype(z.dtype).itemsize
    w_bytes = jnp.dtype(w_fc.dtype).itemsize

    def _vmem_est(tb, tn):
        # Double-buffered working set: z tile, streamed weight slab, bias, out tile.
        return (2 * tb * F * in_bytes
                + 2 * F * tn * w_bytes
                + 2 * tn * 4
                + 2 * tb * tn * 4)

    budget = 28 * 1024 * 1024   # headroom under v7x's 64 MiB physical VMEM
    while _vmem_est(TB, TN) > budget and TB > _SUBLANE:
        TB = max(_SUBLANE, _round_up(TB // 2, _SUBLANE))
    while _vmem_est(TB, TN) > budget and TN > _LANE:
        new_tn = TN // 2
        if new_tn % _LANE != 0 or Cp % new_tn != 0:
            break
        TN = new_tn

    nb = (B + TB - 1) // TB
    nc = Cp // TN
    # Give v7x's second TensorCore something to do when the problem allows it.
    if nb * nc < 2 and B >= 2 * _SUBLANE:
        TB = max(_SUBLANE, _round_up((B + 1) // 2, _SUBLANE))
        nb = (B + TB - 1) // TB

    vmem_limit = int(min(48 * 1024 * 1024,
                         max(2 * _vmem_est(TB, TN), 16 * 1024 * 1024)))

    out_padded = pl.pallas_call(
        _linear_kernel,
        out_shape=jax.ShapeDtypeStruct((B, Cp), jnp.float32),
        grid=(nb, nc),
        in_specs=[
            # Activations: batch-tiled, full K extent (no F padding needed).
            pl.BlockSpec((TB, F), lambda i, j: (i, 0)),
            # Weight: streamed over the class axis in lane-aligned slabs.
            pl.BlockSpec((F, TN), lambda i, j: (0, j)),
            # Bias slab for the current class tile.
            pl.BlockSpec((1, TN), lambda i, j: (0, j)),
        ],
        out_specs=pl.BlockSpec((TB, TN), lambda i, j: (i, j)),
        compiler_params=pltpu.CompilerParams(
            dimension_semantics=("parallel", "parallel"),
            vmem_limit_bytes=vmem_limit,
        ),
    )(z, w_fc, b_p)

    # Slice the class padding back off.
    return out_padded[:, :classes]


def classifier_forward(z, w, b, *, block_b=256, block_c=512,
                       compute_dtype=jnp.float32, min_pallas_elements=1 << 20):
    """Convenience forward matching nn.Linear: y = z @ w.T + b.

    z: [B, F], w: [C, F], b: [C]  ->  [B, C] float32.
    For repeated inference, call prepare_classifier_params() once and use
    classifier_apply() directly to avoid re-doing the weight transform.
    """
    B, F = z.shape
    C = w.shape[0]
    if B * F * C < min_pallas_elements:
        # Tiny problems: plain XLA beats the fixed pallas_call launch cost.
        return (z @ w.T + b).astype(jnp.float32)
    w_fc, b_p = prepare_classifier_params(w, b, compute_dtype)
    return classifier_apply(z.astype(compute_dtype), w_fc, b_p,
                            classes=C, block_b=block_b, block_c=block_c)


if __name__ == "__main__":
    key = jax.random.PRNGKey(0)

    # --- Case 1: small shapes consistent with the module ------------------
    # feature_dim=32, classes=10, batch=8. Force the Pallas path so the
    # kernel itself is exercised (plain XLA would normally handle this size).
    batch, feature_dim, classes = 8, 32, 10
    k_z, k_w, k_b, key = jax.random.split(key, 4)
    bound = 1.0 / (feature_dim ** 0.5)
    w = jax.random.uniform(k_w, (classes, feature_dim), jnp.float32, -bound, bound)
    b = jax.random.uniform(k_b, (classes,), jnp.float32, -bound, bound)
    z = jax.random.normal(k_z, (batch, feature_dim), jnp.float32)

    y = classifier_forward(z, w, b, min_pallas_elements=0)
    y = jax.block_until_ready(y)
    y_ref = z @ w.T + b
    assert y.shape == (batch, classes)
    assert jnp.allclose(y, y_ref, atol=1e-5, rtol=1e-5)

    # --- Case 2: ragged batch + multiple class tiles (multi-step grid) -----
    batch2, feature_dim2, classes2 = 300, 160, 300
    k_z2, k_w2, k_b2, key = jax.random.split(key, 4)
    bound2 = 1.0 / (feature_dim2 ** 0.5)
    w2 = jax.random.uniform(k_w2, (classes2, feature_dim2), jnp.float32, -bound2, bound2)
    b2 = jax.random.uniform(k_b2, (classes2,), jnp.float32, -bound2, bound2)
    z2 = jax.random.normal(k_z2, (batch2, feature_dim2), jnp.float32)

    w2_fc, b2_p = prepare_classifier_params(w2, b2)           # one-time prep
    y2 = classifier_apply(z2, w2_fc, b2_p, classes=classes2)  # hot path
    y2 = jax.block_until_ready(y2)
    y2_ref = z2 @ w2.T + b2
    assert y2.shape == (batch2, classes2)
    assert jnp.allclose(y2, y2_ref, atol=1e-4, rtol=1e-4)

    print("KERNEL_OK")
</pallas_src>

<mosaic_0001>
module attributes {stable_mosaic.version = 11 : i64} {
  func.func @_linear_kernel(%arg0: i32, %arg1: i32, %arg2: memref<8x32xf32, #tpu.memory_space<vmem>>, %arg3: memref<32x128xf32, #tpu.memory_space<vmem>>, %arg4: memref<1x128xf32, #tpu.memory_space<vmem>>, %arg5: memref<8x128xf32, #tpu.memory_space<vmem>>) attributes {dimension_semantics = [#tpu.dimension_semantics<parallel>, #tpu.dimension_semantics<parallel>], iteration_bounds = array<i64: 1, 1>, scalar_prefetch = 0 : i64, scratch_operands = 0 : i64, tpu.core_type = #tpu.core_type<tc>, window_params = [{transform_indices = @transform_0, window_bounds = array<i64: 8, 32>}, {transform_indices = @transform_1, window_bounds = array<i64: 32, 128>}, {transform_indices = @transform_2, window_bounds = array<i64: 1, 128>}, {transform_indices = @transform_3, window_bounds = array<i64: 8, 128>}]} {
    %c0 = arith.constant 0 : index
    %c0_0 = arith.constant 0 : index
    %0 = vector.load %arg2[%c0, %c0_0] : memref<8x32xf32, #tpu.memory_space<vmem>>, vector<8x32xf32>
    %c0_1 = arith.constant 0 : index
    %c0_2 = arith.constant 0 : index
    %1 = vector.load %arg3[%c0_1, %c0_2] : memref<32x128xf32, #tpu.memory_space<vmem>>, vector<32x128xf32>
    %cst = arith.constant dense<0.000000e+00> : vector<8x128xf32>
    %2 = tpu.matmul %0, %1, %cst {dimension_numbers = #tpu.dot_dimension_numbers<[1], [0], [0], [1], [0, 0, 1, 1], [], []>} : vector<8x32xf32>, vector<32x128xf32>, vector<8x128xf32> -> vector<8x128xf32>
    %c0_3 = arith.constant 0 : index
    %c0_4 = arith.constant 0 : index
    %3 = vector.load %arg4[%c0_3, %c0_4] : memref<1x128xf32, #tpu.memory_space<vmem>>, vector<1x128xf32>
    %4 = vector.broadcast %3 : vector<1x128xf32> to vector<8x128xf32>
    %5 = arith.addf %2, %4 : vector<8x128xf32>
    %c0_5 = arith.constant 0 : index
    %c0_6 = arith.constant 0 : index
    %6 = vector.load %arg5[%c0_5, %c0_6] : memref<8x128xf32, #tpu.memory_space<vmem>>, vector<8x128xf32>
    tpu.vector_store %arg5[%c0_5, %c0_6], %5 {strides = array<i32>} : memref<8x128xf32, #tpu.memory_space<vmem>>, vector<8x128xf32>,
    return
  }
  func.func @transform_0(%arg0: i32, %arg1: i32) -> (i32, i32) {
    %c0_i32 = arith.constant 0 : i32
    %c0_i32_0 = arith.constant 0 : i32
    return %arg0, %c0_i32 : i32, i32
  }
  func.func @transform_1(%arg0: i32, %arg1: i32) -> (i32, i32) {
    %c0_i32 = arith.constant 0 : i32
    %c0_i32_0 = arith.constant 0 : i32
    return %c0_i32, %arg1 : i32, i32
  }
  func.func @transform_2(%arg0: i32, %arg1: i32) -> (i32, i32) {
    %c0_i32 = arith.constant 0 : i32
    %c0_i32_0 = arith.constant 0 : i32
    return %c0_i32, %arg1 : i32, i32
  }
  func.func @transform_3(%arg0: i32, %arg1: i32) -> (i32, i32) {
    %c0_i32 = arith.constant 0 : i32
    return %arg0, %arg1 : i32, i32
  }
}

</mosaic_0001>

<bundles_post_ra>
// kernel: classifier_apply.1
= control target key start
LH: loop header
LB: loop body
LE: loop exit
PB: predicated region body
PF: predicated region fallthrough
CT: control target
= control target key end

     0   :  { %8 = vsyncpa [#allocation3], 0  ;;  %s274_s0 = inlined_call_operand.hbm [shape: f32[8,32], index: 0, kind: input, shape index: {}]   ;;  %s275_s1 = inlined_call_operand.hbm [shape: f32[32,128], index: 1, kind: input, shape index: {}]   ;;  %s276_s2 = inlined_call_operand.vmem [shape: f32[1,128], index: 2, kind: input, shape index: {}]   ;;  %s277_s3 = inlined_call_operand.hbm [shape: f32[8,128], index: 3, kind: output, shape index: {}]  }
   0x1   :  { %9 = vsyncpa [#allocation6], 0 }
   0x2   :  { %10 = vsyncpa [#allocation4], 0  ;;  %s235_s12 = smov [#allocation2]   ;;  %s236_s14 = smov [#allocation5]  }
   0x3   :  { %s17_s13 = sshll.u32 %s235_s12, 4  ;;  %s26_s15 = sshll.u32 %s236_s14, 4  ;;  %s18_s13 = int_to_ptr.vmem [resolvable:$true] %s17_s13  ;;  %s27_s15 = int_to_ptr.vmem [resolvable:$true] %s26_s15 }
   0x4   :  { %s177_s16 = scalar_lea.vmem %s18_s13, 128  ;;  %p182_p1 = scmp.lt.s32.totalorder %s18_s13, %s18_s13 }
   0x5   :  { %p178_p0 = scmp.ne.s32.totalorder %s18_s13, %s177_s16  ;;  %p183_p2 = scmp.lt.s32.totalorder %s177_s16, %s177_s16 }
   0x7   :  { %p184_p3 = por %p183_p2, %p182_p1 }
   0x9   :  { %p185_p4 = pnand %p184_p3, %p178_p0 }
   0xb   :  { %188 = shalt.err (!%p185_p4)
}
   0xc   :  { %20 = dma.hbm_to_vmem [thread:$0]  %s274_s0, 128, %s18_s13, [#allocation3]  }
   0xd   :  { %s197_s19 = scalar_lea.vmem %s27_s15, 512  ;;  %p202_p6 = scmp.lt.s32.totalorder %s27_s15, %s27_s15 }
   0xe   :  { %p198_p5 = scmp.ne.s32.totalorder %s27_s15, %s197_s19  ;;  %p203_p7 = scmp.lt.s32.totalorder %s197_s19, %s197_s19 }
  0x10   :  { %p204_p8 = por %p203_p7, %p202_p6 }
  0x12   :  { %p205_p9 = pnand %p204_p8, %p198_p5 }
  0x14   :  { %208 = shalt.err (!%p205_p9)
}
  0x15   :  { %s237_s20 = smov 128   ;;  %s238_s21 = smov 8  }
  0x16   :  { %32 = dma.hbm_to_vmem [thread:$0]  %s275_s1, 512, %s27_s15, [#allocation6], %s237_s20, %s237_s20, %s238_s21  }
  0x17   :  { %229 = dma.done.wait [#allocation3], 128  }
  0x18   :  { %230 = vsyncadd [#allocation3], 4294967168 }
  0x19   :  { %231 = dma.done.wait [#allocation6], 512  }
  0x1a   :  { %232 = vsyncadd [#allocation6], 4294966784  ;;  %v239_v0 = vmov 0.0   ;;  %vm240_vm0 = vmmov 0   ;;  %v45_v1 = vld [vmem:[#allocation5 + $0x18] sm:$0xff]  ;;  %v44_v2 = vld [vmem:[#allocation5 + $0x10] sm:$0xff] }
  0x1b   :  { %151 = vmatprep.subr.mxu0 %v239_v0  ;;  %159 = vmatprep.mubr.msk.f32.mxu0 %vm240_vm0, %v239_v0  ;;  %v43_v3 = vld [vmem:[#allocation5 + $0x8] sm:$0xff]  ;;  %v42_v4 = vld [vmem:[#allocation5] sm:$0xff]  ;;  %v41_v5 = vld [vmem:[#allocation2] sm:$0xff]  ;;  %vm53_vm1 = vcmask 261120   ;;  %s241_s24 = smov [#allocation7]  }
  0x1c   :  { %152 = vmatpush3.msra.mxu0 %v45_v1  ;;  %v144_v6 = vld [vmem:[%s276_s2] ss:$0 sm:$0xff]  ;;  %s134_s25 = sshll.u32 %s241_s24, 4  ;;  %s135_s25 = int_to_ptr.vmem [resolvable:$true] %s134_s25 }
  0x1d   :  { %153 = vmatprep.subr.mxu0 %v239_v0  ;;  %s209_s26 = scalar_lea.vmem %s135_s25, 128  ;;  %p214_p11 = scmp.lt.s32.totalorder %s135_s25, %s135_s25 }
  0x1e   :  { %154 = vmatpush3.msra.mxu0 %v44_v2  ;;  %p210_p10 = scmp.ne.s32.totalorder %s135_s25, %s209_s26  ;;  %p215_p12 = scmp.lt.s32.totalorder %s209_s26, %s209_s26 }
  0x1f   :  { %155 = vmatprep.subr.mxu0 %v239_v0 }
  0x20   :  { %156 = vmatpush3.msra.mxu0 %v43_v3  ;;  %p216_p13 = por %p215_p12, %p214_p11 }
  0x21   :  { %157 = vmatprep.subr.mxu0 %v239_v0 }
  0x22   :  { %158 = vmatpush3.msra.mxu0 %v42_v4  ;;  %p217_p0 = pnand %p216_p13, %p210_p10 }
  0x23   :  { %160 = vmatmul.mubr.msk.f32.vlgmr.msra.gmra.mxu0 %vm53_vm1, %v41_v5 }
  0xe3   :  { %v123_v7 = vpop.f32.mrf.mxu0 }
  0xe4   :  { %v124_v8 = vadd.f32 %v144_v6, %v123_v7 }
  0xe5   :  { %v161_v9 = vpop.f32.mrf.mxu0 }
  0xe6   :  { %127 = vst [vmem:[#allocation7] sm:$0xff] %v124_v8 }
  0xe7   :  { %220 = shalt.err (!%p217_p0)
}
  0xe8   :  { %137 = dma.vmem_to_hbm [thread:$0]  %s135_s25, 128, %s277_s3, [#allocation4]  }
  0xe9   :  { %233 = dma.done.wait [#allocation4], 128  }
  0xea   :  { %234 = vsyncadd [#allocation4], 4294967168 }
  0xeb   :  { %141 = vsyncpa [#allocation3], 1 }
  0xec   :  { %142 = vsyncpa [#allocation6], 1 }
  0xed   :  { %143 = vsyncpa [#allocation4], 1 }

</bundles_post_ra>
